<compile_context>
chip_gen: v5e
topology: v5e:2x2
jax: 0.10.0
libtpu: 0.0.40
codegen_flags: <defaults>
</compile_context>

<pallas_src>
import jax
import jax.numpy as jnp
from jax.experimental import pallas as pl
from jax.experimental.pallas import tpu as pltpu

_IN = 28 * 28
_DIMS = [(_IN, 64), (64, 80), (80, 120), (120, 10)]
_FLOPS_PER_ROW = 2 * sum(fi * fo for fi, fo in _DIMS)   # ~132 kFLOP / row
_LANE = 128


def net_kernel(x_ref,
               w1_ref, b1_ref,
               w2_ref, b2_ref,
               w3_ref, b3_ref,
               w4_ref, b4_ref,
               out_ref):
    h = x_ref[...]

    # fc1..fc3 with relu; MXU accumulates in f32, biases stay f32.
    for w_ref, b_ref in ((w1_ref, b1_ref), (w2_ref, b2_ref), (w3_ref, b3_ref)):
        h = jnp.dot(h.astype(w_ref.dtype), w_ref[...],
                    preferred_element_type=jnp.float32) + b_ref[...]
        h = jnp.maximum(h, 0.0)

    logits = jnp.dot(h.astype(w4_ref.dtype), w4_ref[...],
                     preferred_element_type=jnp.float32) + b4_ref[...]

    # log_softmax over dim=1 (numerically stable, all f32).
    m = jnp.max(logits, axis=1, keepdims=True)
    shifted = logits - m
    lse = jnp.log(jnp.sum(jnp.exp(shifted), axis=1, keepdims=True))

    # Lane-dense store: (TILE_B, 10) -> (10, TILE_B) via one XLU transpose.
    out_ref[...] = (shifted - lse).T.astype(out_ref.dtype)


def _round_up(x, m):
    return ((x + m - 1) // m) * m


def _vmem_budget_bytes():
    # Per-chip VMEM sizing: half of physical VMEM is our budget (64 MiB on
    # v5e/v6e, 32 MiB on v7x).  Falls back to the v7x-safe 32 MiB budget.
    phys = 64 * 1024 * 1024
    try:
        info = pltpu.get_tpu_info()
        phys = int(getattr(info, "vmem_capacity_bytes", phys))
    except Exception:
        pass
    return phys // 2


def _choose_tile_b(batch, x_itemsize, vmem_budget):
    """Pick the batch tile.

    Conservative per-row VMEM bytes: double-buffered x tile, one in-body copy
    of the x tile (dtype cast / matmul staging), f32 intermediates
    (h1..h3, logits, softmax temps, transposed store) and the dbuf'd output.
    """
    per_row = 3 * _IN * x_itemsize + 2048
    reserve = 2 * 1024 * 1024            # double-buffered weights/biases + slack
    max_tile = (vmem_budget - reserve) // per_row
    max_tile = max(_LANE, (max_tile // _LANE) * _LANE)
    max_tile = min(max_tile, 4096)       # beyond this, per-step overhead is <1%

    # Aim for >= 2 grid steps so the batch axis shards across v7x's two TCs.
    target = max(_LANE, _round_up(pl.cdiv(batch, 2), _LANE))
    tile = min(max_tile, target)
    if tile >= batch:
        tile = batch                     # single full-extent block (no (8,128) issue)
    return tile


def net_forward(x, params, *, weight_dtype=None, tile_b=None):
    """x: (B, 784) float array (f32 for exact semantics, bf16 for the fast
    path -- produced upstream, the wrapper never casts or pads x).
    params: dict of (in,out) weights and (1,out) biases."""
    B, D = x.shape
    assert D == _IN

    # Weights are tiny (~264 KiB) and DMA'd once; match their dtype to x by
    # default (f32 x => exact module numerics, bf16 x => single-pass bf16 MXU).
    if weight_dtype is None:
        weight_dtype = x.dtype
    ws = [params[f"w{i}"].astype(weight_dtype) for i in range(1, 5)]
    bs = [params[f"b{i}"].astype(jnp.float32) for i in range(1, 5)]

    vmem_budget = _vmem_budget_bytes()
    if tile_b is None:
        tile_b = _choose_tile_b(B, x.dtype.itemsize, vmem_budget)
    else:
        # Lane-dense transposed output needs tile_b % 128 == 0 unless the tile
        # covers the whole batch.
        assert tile_b == B or (tile_b % _LANE == 0), "tile_b must be B or a multiple of 128"
    num_tiles = pl.cdiv(B, tile_b)

    # x tiles walk the batch grid (auto double-buffered DMA); weights/biases
    # use constant index_maps so they are fetched once and stay VMEM-resident.
    in_specs = [pl.BlockSpec((tile_b, D), lambda i: (i, 0))]
    for w, b in zip(ws, bs):
        in_specs.append(pl.BlockSpec(w.shape, lambda i: (0, 0)))
        in_specs.append(pl.BlockSpec(b.shape, lambda i: (0, 0)))

    # Transposed (10, B) output => lane-dense (10, tile_b) blocks.
    out_spec = pl.BlockSpec((10, tile_b), lambda i: (0, i))

    param_bytes = sum(a.size * a.dtype.itemsize for a in ws + bs)
    cost = pl.CostEstimate(
        flops=B * _FLOPS_PER_ROW,
        transcendentals=B * 10,                              # exp in log_softmax
        bytes_accessed=(B * D * x.dtype.itemsize             # x stream (dominant)
                        + B * 10 * 4                          # output
                        + param_bytes),                       # weights (once)
    )

    out_t = pl.pallas_call(
        net_kernel,
        out_shape=jax.ShapeDtypeStruct((10, B), jnp.float32),
        grid=(num_tiles,),
        in_specs=in_specs,
        out_specs=out_spec,
        compiler_params=pltpu.CompilerParams(
            dimension_semantics=("parallel",),
            vmem_limit_bytes=int(vmem_budget)),
        cost_estimate=cost,
    )(x,
      ws[0], bs[0],
      ws[1], bs[1],
      ws[2], bs[2],
      ws[3], bs[3])

    # Tiny (B x 10 x 4B) un-transpose; negligible vs. the 784-wide x stream.
    return out_t.T


def init_params(key):
    """Deterministic PyTorch-style init: U(-1/sqrt(fan_in), +1/sqrt(fan_in))."""
    params = {}
    keys = jax.random.split(key, 2 * len(_DIMS))
    for i, (fan_in, fan_out) in enumerate(_DIMS):
        bound = 1.0 / (fan_in ** 0.5)
        params[f"w{i+1}"] = jax.random.uniform(
            keys[2 * i], (fan_in, fan_out), jnp.float32, -bound, bound)
        params[f"b{i+1}"] = jax.random.uniform(
            keys[2 * i + 1], (1, fan_out), jnp.float32, -bound, bound)
    return params


def net_forward_ref(x, params, compute_dtype=jnp.float32):
    """Pure-JAX reference. compute_dtype=f32 == exact PyTorch semantics;
    compute_dtype=bf16 mirrors the kernel's bf16 fast path."""
    h = x.astype(compute_dtype)
    for i in range(1, 5):
        w = params[f"w{i}"].astype(compute_dtype)
        h = jnp.dot(h.astype(compute_dtype), w,
                    preferred_element_type=jnp.float32) + params[f"b{i}"]
        if i < 4:
            h = jnp.maximum(h, 0.0)
    return jax.nn.log_softmax(h, axis=1)


if __name__ == "__main__":
    key = jax.random.PRNGKey(0)
    pkey, xkey, xkey2 = jax.random.split(key, 3)
    params = init_params(pkey)

    # 1) Small batch, exact f32 semantics of the original module
    #    (single full-batch block, no casting anywhere).
    B = 8
    x = jax.random.normal(xkey, (B, _IN), jnp.float32)
    out_f32 = net_forward(x, params)
    jax.block_until_ready(out_f32)
    ref_f32 = net_forward_ref(x, params, jnp.float32)
    assert out_f32.shape == (B, 10)
    assert jnp.allclose(out_f32, ref_f32, atol=1e-4, rtol=1e-4)

    # 2) bf16 x produced upstream (no wrapper-side cast/pad).  B=200 exercises
    #    the multi-step batch grid (tile 128 -> 2 steps, >=2 TCs on v7x) and
    #    the masked trailing block.
    B2 = 200
    x2 = jax.random.normal(xkey2, (B2, _IN), jnp.float32)
    out_bf16 = net_forward(x2.astype(jnp.bfloat16), params)
    jax.block_until_ready(out_bf16)
    ref_bf16 = net_forward_ref(x2, params, jnp.bfloat16)
    assert out_bf16.shape == (B2, 10)
    assert jnp.allclose(out_bf16, ref_bf16, atol=2e-3, rtol=2e-3)

    print("KERNEL_OK")
</pallas_src>

<mosaic_0001>
module attributes {stable_mosaic.version = 11 : i64} {
  func.func @net_kernel(%arg0: i32, %arg1: memref<8x784xf32, #tpu.memory_space<vmem>>, %arg2: memref<784x64xf32, #tpu.memory_space<vmem>>, %arg3: memref<1x64xf32, #tpu.memory_space<vmem>>, %arg4: memref<64x80xf32, #tpu.memory_space<vmem>>, %arg5: memref<1x80xf32, #tpu.memory_space<vmem>>, %arg6: memref<80x120xf32, #tpu.memory_space<vmem>>, %arg7: memref<1x120xf32, #tpu.memory_space<vmem>>, %arg8: memref<120x10xf32, #tpu.memory_space<vmem>>, %arg9: memref<1x10xf32, #tpu.memory_space<vmem>>, %arg10: memref<10x8xf32, #tpu.memory_space<vmem>>) attributes {dimension_semantics = [#tpu.dimension_semantics<parallel>], iteration_bounds = array<i64: 1>, scalar_prefetch = 0 : i64, scratch_operands = 0 : i64, tpu.core_type = #tpu.core_type<tc>, window_params = [{transform_indices = @transform_0, window_bounds = array<i64: 8, 784>}, {pipeline_mode = #tpu.pipeline_mode<synchronous>, transform_indices = @transform_1, window_bounds = array<i64: 784, 64>}, {pipeline_mode = #tpu.pipeline_mode<synchronous>, transform_indices = @transform_2, window_bounds = array<i64: 1, 64>}, {pipeline_mode = #tpu.pipeline_mode<synchronous>, transform_indices = @transform_3, window_bounds = array<i64: 64, 80>}, {pipeline_mode = #tpu.pipeline_mode<synchronous>, transform_indices = @transform_4, window_bounds = array<i64: 1, 80>}, {pipeline_mode = #tpu.pipeline_mode<synchronous>, transform_indices = @transform_5, window_bounds = array<i64: 80, 120>}, {pipeline_mode = #tpu.pipeline_mode<synchronous>, transform_indices = @transform_6, window_bounds = array<i64: 1, 120>}, {pipeline_mode = #tpu.pipeline_mode<synchronous>, transform_indices = @transform_7, window_bounds = array<i64: 120, 10>}, {pipeline_mode = #tpu.pipeline_mode<synchronous>, transform_indices = @transform_8, window_bounds = array<i64: 1, 10>}, {transform_indices = @transform_9, window_bounds = array<i64: 10, 8>}]} {
    %c0 = arith.constant 0 : index
    %c0_0 = arith.constant 0 : index
    %0 = vector.load %arg1[%c0, %c0_0] : memref<8x784xf32, #tpu.memory_space<vmem>>, vector<8x784xf32>
    %c0_1 = arith.constant 0 : index
    %c0_2 = arith.constant 0 : index
    %1 = vector.load %arg2[%c0_1, %c0_2] : memref<784x64xf32, #tpu.memory_space<vmem>>, vector<784x64xf32>
    %cst = arith.constant dense<0.000000e+00> : vector<8x64xf32>
    %2 = tpu.matmul %0, %1, %cst {dimension_numbers = #tpu.dot_dimension_numbers<[1], [0], [0], [1], [0, 0, 1, 1], [], []>} : vector<8x784xf32>, vector<784x64xf32>, vector<8x64xf32> -> vector<8x64xf32>
    %c0_3 = arith.constant 0 : index
    %c0_4 = arith.constant 0 : index
    %3 = vector.load %arg3[%c0_3, %c0_4] : memref<1x64xf32, #tpu.memory_space<vmem>>, vector<1x64xf32>
    %4 = vector.broadcast %3 : vector<1x64xf32> to vector<8x64xf32>
    %5 = arith.addf %2, %4 : vector<8x64xf32>
    %cst_5 = arith.constant 0.000000e+00 : f32
    %6 = vector.broadcast %cst_5 : f32 to vector<8x64xf32>
    %7 = arith.maximumf %5, %6 : vector<8x64xf32>
    %c0_6 = arith.constant 0 : index
    %c0_7 = arith.constant 0 : index
    %8 = vector.load %arg4[%c0_6, %c0_7] : memref<64x80xf32, #tpu.memory_space<vmem>>, vector<64x80xf32>
    %cst_8 = arith.constant dense<0.000000e+00> : vector<8x80xf32>
    %9 = tpu.matmul %7, %8, %cst_8 {dimension_numbers = #tpu.dot_dimension_numbers<[1], [0], [0], [1], [0, 0, 1, 1], [], []>} : vector<8x64xf32>, vector<64x80xf32>, vector<8x80xf32> -> vector<8x80xf32>
    %c0_9 = arith.constant 0 : index
    %c0_10 = arith.constant 0 : index
    %10 = vector.load %arg5[%c0_9, %c0_10] : memref<1x80xf32, #tpu.memory_space<vmem>>, vector<1x80xf32>
    %11 = vector.broadcast %10 : vector<1x80xf32> to vector<8x80xf32>
    %12 = arith.addf %9, %11 : vector<8x80xf32>
    %cst_11 = arith.constant 0.000000e+00 : f32
    %13 = vector.broadcast %cst_11 : f32 to vector<8x80xf32>
    %14 = arith.maximumf %12, %13 : vector<8x80xf32>
    %c0_12 = arith.constant 0 : index
    %c0_13 = arith.constant 0 : index
    %15 = vector.load %arg6[%c0_12, %c0_13] : memref<80x120xf32, #tpu.memory_space<vmem>>, vector<80x120xf32>
    %cst_14 = arith.constant dense<0.000000e+00> : vector<8x120xf32>
    %16 = tpu.matmul %14, %15, %cst_14 {dimension_numbers = #tpu.dot_dimension_numbers<[1], [0], [0], [1], [0, 0, 1, 1], [], []>} : vector<8x80xf32>, vector<80x120xf32>, vector<8x120xf32> -> vector<8x120xf32>
    %c0_15 = arith.constant 0 : index
    %c0_16 = arith.constant 0 : index
    %17 = vector.load %arg7[%c0_15, %c0_16] : memref<1x120xf32, #tpu.memory_space<vmem>>, vector<1x120xf32>
    %18 = vector.broadcast %17 : vector<1x120xf32> to vector<8x120xf32>
    %19 = arith.addf %16, %18 : vector<8x120xf32>
    %cst_17 = arith.constant 0.000000e+00 : f32
    %20 = vector.broadcast %cst_17 : f32 to vector<8x120xf32>
    %21 = arith.maximumf %19, %20 : vector<8x120xf32>
    %c0_18 = arith.constant 0 : index
    %c0_19 = arith.constant 0 : index
    %22 = vector.load %arg8[%c0_18, %c0_19] : memref<120x10xf32, #tpu.memory_space<vmem>>, vector<120x10xf32>
    %cst_20 = arith.constant dense<0.000000e+00> : vector<8x10xf32>
    %23 = tpu.matmul %21, %22, %cst_20 {dimension_numbers = #tpu.dot_dimension_numbers<[1], [0], [0], [1], [0, 0, 1, 1], [], []>} : vector<8x120xf32>, vector<120x10xf32>, vector<8x10xf32> -> vector<8x10xf32>
    %c0_21 = arith.constant 0 : index
    %c0_22 = arith.constant 0 : index
    %24 = vector.load %arg9[%c0_21, %c0_22] : memref<1x10xf32, #tpu.memory_space<vmem>>, vector<1x10xf32>
    %25 = vector.broadcast %24 : vector<1x10xf32> to vector<8x10xf32>
    %26 = arith.addf %23, %25 : vector<8x10xf32>
    %cst_23 = arith.constant dense<0xFF800000> : vector<8xf32>
    %27 = vector.multi_reduction <maximumf>, %26, %cst_23 [1] : vector<8x10xf32> to vector<8xf32>
    %28 = vector.shape_cast %27 : vector<8xf32> to vector<8x1xf32>
    %29 = vector.broadcast %28 : vector<8x1xf32> to vector<8x10xf32>
    %30 = arith.subf %26, %29 : vector<8x10xf32>
    %31 = math.exp %30 : vector<8x10xf32>
    %cst_24 = arith.constant dense<0.000000e+00> : vector<8xf32>
    %32 = vector.multi_reduction <add>, %31, %cst_24 [1] : vector<8x10xf32> to vector<8xf32>
    %33 = vector.shape_cast %32 : vector<8xf32> to vector<8x1xf32>
    %34 = math.log %33 : vector<8x1xf32>
    %35 = vector.broadcast %34 : vector<8x1xf32> to vector<8x10xf32>
    %36 = arith.subf %30, %35 : vector<8x10xf32>
    %37 = tpu.transpose %36, [1, 0] : vector<8x10xf32> -> vector<10x8xf32>
    %c0_25 = arith.constant 0 : index
    %c0_26 = arith.constant 0 : index
    %38 = vector.load %arg10[%c0_25, %c0_26] : memref<10x8xf32, #tpu.memory_space<vmem>>, vector<10x8xf32>
    tpu.vector_store %arg10[%c0_25, %c0_26], %37 {strides = array<i32>} : memref<10x8xf32, #tpu.memory_space<vmem>>, vector<10x8xf32>,
    return
  }
  func.func @transform_0(%arg0: i32) -> (i32, i32) {
    %c0_i32 = arith.constant 0 : i32
    %c0_i32_0 = arith.constant 0 : i32
    return %arg0, %c0_i32 : i32, i32
  }
  func.func @transform_1(%arg0: i32) -> (i32, i32) {
    %c0_i32 = arith.constant 0 : i32
    %c0_i32_0 = arith.constant 0 : i32
    %c0_i32_1 = arith.constant 0 : i32
    return %c0_i32, %c0_i32_0 : i32, i32
  }
  func.func @transform_2(%arg0: i32) -> (i32, i32) {
    %c0_i32 = arith.constant 0 : i32
    %c0_i32_0 = arith.constant 0 : i32
    %c0_i32_1 = arith.constant 0 : i32
    return %c0_i32, %c0_i32_0 : i32, i32
  }
  func.func @transform_3(%arg0: i32) -> (i32, i32) {
    %c0_i32 = arith.constant 0 : i32
    %c0_i32_0 = arith.constant 0 : i32
    %c0_i32_1 = arith.constant 0 : i32
    return %c0_i32, %c0_i32_0 : i32, i32
  }
  func.func @transform_4(%arg0: i32) -> (i32, i32) {
    %c0_i32 = arith.constant 0 : i32
    %c0_i32_0 = arith.constant 0 : i32
    %c0_i32_1 = arith.constant 0 : i32
    return %c0_i32, %c0_i32_0 : i32, i32
  }
  func.func @transform_5(%arg0: i32) -> (i32, i32) {
    %c0_i32 = arith.constant 0 : i32
    %c0_i32_0 = arith.constant 0 : i32
    %c0_i32_1 = arith.constant 0 : i32
    return %c0_i32, %c0_i32_0 : i32, i32
  }
  func.func @transform_6(%arg0: i32) -> (i32, i32) {
    %c0_i32 = arith.constant 0 : i32
    %c0_i32_0 = arith.constant 0 : i32
    %c0_i32_1 = arith.constant 0 : i32
    return %c0_i32, %c0_i32_0 : i32, i32
  }
  func.func @transform_7(%arg0: i32) -> (i32, i32) {
    %c0_i32 = arith.constant 0 : i32
    %c0_i32_0 = arith.constant 0 : i32
    %c0_i32_1 = arith.constant 0 : i32
    return %c0_i32, %c0_i32_0 : i32, i32
  }
  func.func @transform_8(%arg0: i32) -> (i32, i32) {
    %c0_i32 = arith.constant 0 : i32
    %c0_i32_0 = arith.constant 0 : i32
    %c0_i32_1 = arith.constant 0 : i32
    return %c0_i32, %c0_i32_0 : i32, i32
  }
  func.func @transform_9(%arg0: i32) -> (i32, i32) {
    %c0_i32 = arith.constant 0 : i32
    %c0_i32_0 = arith.constant 0 : i32
    return %c0_i32, %arg0 : i32, i32
  }
}

</mosaic_0001>

<bundles_post_ra>
// kernel: tpu_custom_call.1
= control target key start
LH: loop header
LB: loop body
LE: loop exit
PB: predicated region body
PF: predicated region fallthrough
CT: control target
= control target key end

     0   :  { %vm141_vm0 = vcmask 130048   ;;  %vm298_vm1 = vcmask 523264   ;;  %vm337_vm2 = vcmask 654336   ;;  %vm381_vm3 = vcmask 982016   ;;  %s953_s1 = inlined_call_operand.vmem [shape: f32[784,64], index: 1, kind: input, shape index: {}]   ;;  %s954_s2 = inlined_call_operand.vmem [shape: f32[1,64], index: 2, kind: input, shape index: {}]   ;;  %s955_s0 = inlined_call_operand.vmem [shape: f32[8,784], index: 0, kind: input, shape index: {}]   ;;  %s956_s4 = inlined_call_operand.vmem [shape: f32[1,80], index: 4, kind: input, shape index: {}]   ;;  %s957_s3 = inlined_call_operand.vmem [shape: f32[64,80], index: 3, kind: input, shape index: {}]   ;;  %s958_s5 = inlined_call_operand.vmem [shape: f32[80,120], index: 5, kind: input, shape index: {}]   ;;  %s959_s6 = inlined_call_operand.vmem [shape: f32[1,120], index: 6, kind: input, shape index: {}]   ;;  %s960_s7 = inlined_call_operand.vmem [shape: f32[120,10], index: 7, kind: input, shape index: {}]   ;;  %s961_s8 = inlined_call_operand.vmem [shape: f32[1,10], index: 8, kind: input, shape index: {}]   ;;  %s962_s9 = inlined_call_operand.vmem [shape: f32[10,8], index: 9, kind: output, shape index: {}]  }
   0x1   :  { %v54_v0 = vld [vmem:[%s953_s1 + $0x78] sm:$0xff]  ;;  %v53_v1 = vld [vmem:[%s953_s1 + $0x70] sm:$0xff]  ;;  %v52_v4 = vld [vmem:[%s953_s1 + $0x68] sm:$0xff]  ;;  %vm405_vm4 = vcmask 80896   ;;  %vm450_vm5 = vcmask 64512   ;;  %vm452_vm6 = vcmask 58368  }
   0x2   :  { %v70_v2 = vld [vmem:[%s953_s1 + $0xf8] sm:$0xff]  ;;  %145 = vmatpush.msra.mxu0 %v54_v0  ;;  %v69_v3 = vld [vmem:[%s953_s1 + $0xf0] sm:$0xff]  ;;  %v68_v5 = vld [vmem:[%s953_s1 + $0xe8] sm:$0xff] }
   0x3   :  { %165 = vmatpush.msra.mxu1 %v70_v2  ;;  %v51_v6 = vld [vmem:[%s953_s1 + $0x60] sm:$0xff]  ;;  %v50_v8 = vld [vmem:[%s953_s1 + $0x58] sm:$0xff]  ;;  %v85_v11 = vld [vmem:[%s953_s1 + $0x170] sm:$0xff] }
   0x4   :  { %146 = vmatpush.msra.mxu0 %v53_v1  ;;  %v67_v7 = vld [vmem:[%s953_s1 + $0xe0] sm:$0xff]  ;;  %v66_v9 = vld [vmem:[%s953_s1 + $0xd8] sm:$0xff]  ;;  %v49_v13 = vld [vmem:[%s953_s1 + $0x50] sm:$0xff] }
   0x5   :  { %166 = vmatpush.msra.mxu1 %v69_v3  ;;  %v86_v10 = vld [vmem:[%s953_s1 + $0x178] sm:$0xff]  ;;  %v65_v14 = vld [vmem:[%s953_s1 + $0xd0] sm:$0xff]  ;;  %v84_v15 = vld [vmem:[%s953_s1 + $0x168] sm:$0xff] }
   0x6   :  { %147 = vmatpush.msra.mxu0 %v52_v4  ;;  %v102_v12 = vld [vmem:[%s953_s1 + $0x1f8] sm:$0xff]  ;;  %185 = vmatpush.msra.mxu2 %v86_v10  ;;  %v101_v16 = vld [vmem:[%s953_s1 + $0x1f0] sm:$0xff]  ;;  %v48_v17 = vld [vmem:[%s953_s1 + $0x48] sm:$0xff] }
   0x7   :  { %167 = vmatpush.msra.mxu1 %v68_v5  ;;  %205 = vmatpush.msra.mxu3 %v102_v12  ;;  %v64_v18 = vld [vmem:[%s953_s1 + $0xc8] sm:$0xff]  ;;  %v83_v20 = vld [vmem:[%s953_s1 + $0x160] sm:$0xff]  ;;  %v82_v24 = vld [vmem:[%s953_s1 + $0x158] sm:$0xff] }
   0x8   :  { %148 = vmatpush.msra.mxu0 %v51_v6  ;;  %186 = vmatpush.msra.mxu2 %v85_v11  ;;  %v100_v19 = vld [vmem:[%s953_s1 + $0x1e8] sm:$0xff]  ;;  %v99_v21 = vld [vmem:[%s953_s1 + $0x1e0] sm:$0xff]  ;;  %v98_v25 = vld [vmem:[%s953_s1 + $0x1d8] sm:$0xff] }
   0x9   :  { %168 = vmatpush.msra.mxu1 %v67_v7  ;;  %206 = vmatpush.msra.mxu3 %v101_v16  ;;  %v47_v22 = vld [vmem:[%s953_s1 + $0x40] sm:$0xff]  ;;  %v46_v26 = vld [vmem:[%s953_s1 + $0x38] sm:$0xff]  ;;  %v81_v28 = vld [vmem:[%s953_s1 + $0x150] sm:$0xff] }
   0xa   :  { %149 = vmatpush.msra.mxu0 %v50_v8  ;;  %v63_v23 = vld [vmem:[%s953_s1 + $0xc0] sm:$0xff]  ;;  %187 = vmatpush.msra.mxu2 %v84_v15  ;;  %v62_v27 = vld [vmem:[%s953_s1 + $0xb8] sm:$0xff]  ;;  %v97_v29 = vld [vmem:[%s953_s1 + $0x1d0] sm:$0xff] }
   0xb   :  { %169 = vmatpush.msra.mxu1 %v66_v9  ;;  %207 = vmatpush.msra.mxu3 %v100_v19  ;;  %v45_v30 = vld [vmem:[%s953_s1 + $0x30] sm:$0xff]  ;;  %v80_v32 = vld [vmem:[%s953_s1 + $0x148] sm:$0xff]  ;;  %v79_v36 = vld [vmem:[%s953_s1 + $0x140] sm:$0xff] }
   0xc   :  { %150 = vmatpush.msra.mxu0 %v49_v13  ;;  %188 = vmatpush.msra.mxu2 %v83_v20  ;;  %v61_v31 = vld [vmem:[%s953_s1 + $0xb0] sm:$0xff]  ;;  %v96_v33 = vld [vmem:[%s953_s1 + $0x1c8] sm:$0xff]  ;;  %v95_v37 = vld [vmem:[%s953_s1 + $0x1c0] sm:$0xff] }
   0xd   :  { %170 = vmatpush.msra.mxu1 %v65_v14  ;;  %208 = vmatpush.msra.mxu3 %v99_v21  ;;  %v44_v34 = vld [vmem:[%s953_s1 + $0x28] sm:$0xff]  ;;  %v43_v38 = vld [vmem:[%s953_s1 + $0x20] sm:$0xff]  ;;  %v78_v40 = vld [vmem:[%s953_s1 + $0x138] sm:$0xff] }
   0xe   :  { %151 = vmatpush.msra.mxu0 %v48_v17  ;;  %189 = vmatpush.msra.mxu2 %v82_v24  ;;  %v60_v35 = vld [vmem:[%s953_s1 + $0xa8] sm:$0xff]  ;;  %v59_v39 = vld [vmem:[%s953_s1 + $0xa0] sm:$0xff]  ;;  %v94_v41 = vld [vmem:[%s953_s1 + $0x1b8] sm:$0xff] }
   0xf   :  { %171 = vmatpush.msra.mxu1 %v64_v18  ;;  %209 = vmatpush.msra.mxu3 %v98_v25  ;;  %v42_v42 = vld [vmem:[%s953_s1 + $0x18] sm:$0xff]  ;;  %v77_v44 = vld [vmem:[%s953_s1 + $0x130] sm:$0xff]  ;;  %v76_v48 = vld [vmem:[%s953_s1 + $0x128] sm:$0xff] }
  0x10   :  { %152 = vmatpush.msra.mxu0 %v47_v22  ;;  %190 = vmatpush.msra.mxu2 %v81_v28  ;;  %v58_v43 = vld [vmem:[%s953_s1 + $0x98] sm:$0xff]  ;;  %v93_v45 = vld [vmem:[%s953_s1 + $0x1b0] sm:$0xff]  ;;  %v92_v49 = vld [vmem:[%s953_s1 + $0x1a8] sm:$0xff] }
  0x11   :  { %172 = vmatpush.msra.mxu1 %v63_v23  ;;  %210 = vmatpush.msra.mxu3 %v97_v29  ;;  %v41_v46 = vld [vmem:[%s953_s1 + $0x10] sm:$0xff]  ;;  %v40_v50 = vld [vmem:[%s953_s1 + $0x8] sm:$0xff]  ;;  %v75_v52 = vld [vmem:[%s953_s1 + $0x120] sm:$0xff] }
  0x12   :  { %153 = vmatpush.msra.mxu0 %v46_v26  ;;  %191 = vmatpush.msra.mxu2 %v80_v32  ;;  %v57_v47 = vld [vmem:[%s953_s1 + $0x90] sm:$0xff]  ;;  %v56_v51 = vld [vmem:[%s953_s1 + $0x88] sm:$0xff]  ;;  %v91_v53 = vld [vmem:[%s953_s1 + $0x1a0] sm:$0xff] }
  0x13   :  { %173 = vmatpush.msra.mxu1 %v62_v27  ;;  %211 = vmatpush.msra.mxu3 %v96_v33  ;;  %v39_v54 = vld [vmem:[%s953_s1] sm:$0xff]  ;;  %v118_v56 = vld [vmem:[%s953_s1 + $0x278] sm:$0xff]  ;;  %v117_v60 = vld [vmem:[%s953_s1 + $0x270] sm:$0xff] }
  0x14   :  { %154 = vmatpush.msra.mxu0 %v45_v30  ;;  %192 = vmatpush.msra.mxu2 %v79_v36  ;;  %v55_v55 = vld [vmem:[%s953_s1 + $0x80] sm:$0xff]  ;;  %v134_v57 = vld [vmem:[%s953_s1 + $0x2f8] sm:$0xff]  ;;  %v133_v61 = vld [vmem:[%s953_s1 + $0x2f0] sm:$0xff] }
  0x15   :  { %174 = vmatpush.msra.mxu1 %v61_v31  ;;  %212 = vmatpush.msra.mxu3 %v95_v37  ;;  %v74_v58 = vld [vmem:[%s953_s1 + $0x118] sm:$0xff]  ;;  %v73_v62 = vld [vmem:[%s953_s1 + $0x110] sm:$0xff]  ;;  %v116_v0 = vld [vmem:[%s953_s1 + $0x268] sm:$0xff] }
  0x16   :  { %155 = vmatpush.msra.mxu0 %v44_v34  ;;  %193 = vmatpush.msra.mxu2 %v78_v40  ;;  %v90_v59 = vld [vmem:[%s953_s1 + $0x198] sm:$0xff]  ;;  %v89_v63 = vld [vmem:[%s953_s1 + $0x190] sm:$0xff]  ;;  %v132_v1 = vld [vmem:[%s953_s1 + $0x2e8] sm:$0xff] }
  0x17   :  { %175 = vmatpush.msra.mxu1 %v60_v35  ;;  %213 = vmatpush.msra.mxu3 %v94_v41  ;;  %v72_v2 = vld [vmem:[%s953_s1 + $0x108] sm:$0xff]  ;;  %v115_v4 = vld [vmem:[%s953_s1 + $0x260] sm:$0xff]  ;;  %v114_v8 = vld [vmem:[%s953_s1 + $0x258] sm:$0xff] }
  0x18   :  { %156 = vmatpush.msra.mxu0 %v43_v38  ;;  %194 = vmatpush.msra.mxu2 %v77_v44  ;;  %v88_v3 = vld [vmem:[%s953_s1 + $0x188] sm:$0xff]  ;;  %v131_v5 = vld [vmem:[%s953_s1 + $0x2e0] sm:$0xff]  ;;  %v130_v9 = vld [vmem:[%s953_s1 + $0x2d8] sm:$0xff] }
  0x19   :  { %176 = vmatpush.msra.mxu1 %v59_v39  ;;  %214 = vmatpush.msra.mxu3 %v93_v45  ;;  %v71_v6 = vld [vmem:[%s953_s1 + $0x100] sm:$0xff]  ;;  %v34_v10 = vld [vmem:[%s955_s0 + $0x10] sm:$0xff]  ;;  %v35_v14 = vld [vmem:[%s955_s0 + $0x18] sm:$0xff] }
  0x1a   :  { %157 = vmatpush.msra.mxu0 %v42_v42  ;;  %195 = vmatpush.msra.mxu2 %v76_v48  ;;  %v87_v7 = vld [vmem:[%s953_s1 + $0x180] sm:$0xff]  ;;  %v113_v12 = vld [vmem:[%s953_s1 + $0x250] sm:$0xff]  ;;  %v33_v15 = vld [vmem:[%s955_s0 + $0x8] sm:$0xff] }
  0x1b   :  { %177 = vmatpush.msra.mxu1 %v58_v43  ;;  %215 = vmatpush.msra.mxu3 %v92_v49  ;;  %v32_v11 = vld [vmem:[%s955_s0] sm:$0xff]  ;;  %v129_v13 = vld [vmem:[%s953_s1 + $0x2d0] sm:$0xff]  ;;  %v112_v16 = vld [vmem:[%s953_s1 + $0x248] sm:$0xff] }
  0x1c   :  { %158 = vmatpush.msra.mxu0 %v41_v46  ;;  %196 = vmatpush.msra.mxu2 %v75_v52  ;;  %v128_v17 = vld [vmem:[%s953_s1 + $0x2c8] sm:$0xff]  ;;  %v111_v19 = vld [vmem:[%s953_s1 + $0x240] sm:$0xff]  ;;  %v110_v22 = vld [vmem:[%s953_s1 + $0x238] sm:$0xff] }
  0x1d   :  { %178 = vmatpush.msra.mxu1 %v57_v47  ;;  %216 = vmatpush.msra.mxu3 %v91_v53  ;;  %v136_v18 = vld [vmem:[%s953_s1 + $0x308] sm:$0xff]  ;;  %v127_v20 = vld [vmem:[%s953_s1 + $0x2c0] sm:$0xff]  ;;  %v126_v23 = vld [vmem:[%s953_s1 + $0x2b8] sm:$0xff] }
  0x1e   :  { %159 = vmatpush.msra.mxu0 %v40_v50  ;;  %197 = vmatpush.msra.mxu2 %v74_v58  ;;  %v135_v21 = vld [vmem:[%s953_s1 + $0x300] sm:$0xff]  ;;  %v109_v24 = vld [vmem:[%s953_s1 + $0x230] sm:$0xff]  ;;  %v108_v27 = vld [vmem:[%s953_s1 + $0x228] sm:$0xff] }
  0x1f   :  { %179 = vmatpush.msra.mxu1 %v56_v51  ;;  %217 = vmatpush.msra.mxu3 %v90_v59  ;;  %v125_v25 = vld [vmem:[%s953_s1 + $0x2b0] sm:$0xff]  ;;  %v124_v28 = vld [vmem:[%s953_s1 + $0x2a8] sm:$0xff]  ;;  %v107_v29 = vld [vmem:[%s953_s1 + $0x220] sm:$0xff] }
  0x20   :  { %160 = vmatpush.msra.mxu0 %v39_v54  ;;  %198 = vmatpush.msra.mxu2 %v73_v62  ;;  %v38_v26 = vld [vmem:[%s955_s0 + $0x30] sm:$0xff]  ;;  %v123_v30 = vld [vmem:[%s953_s1 + $0x2a0] sm:$0xff]  ;;  %v106_v31 = vld [vmem:[%s953_s1 + $0x218] sm:$0xff] }
  0x21   :  { %180 = vmatpush.msra.mxu1 %v55_v55  ;;  %218 = vmatpush.msra.mxu3 %v89_v63  ;;  %v122_v32 = vld [vmem:[%s953_s1 + $0x298] sm:$0xff]  ;;  %v105_v33 = vld [vmem:[%s953_s1 + $0x210] sm:$0xff]  ;;  %v104_v35 = vld [vmem:[%s953_s1 + $0x208] sm:$0xff] }
  0x22   :  { %225 = vmatpush.msrb.mxu0 %v118_v56  ;;  %199 = vmatpush.msra.mxu2 %v72_v2  ;;  %v121_v34 = vld [vmem:[%s953_s1 + $0x290] sm:$0xff]  ;;  %v120_v36 = vld [vmem:[%s953_s1 + $0x288] sm:$0xff]  ;;  %v103_v37 = vld [vmem:[%s953_s1 + $0x200] sm:$0xff] }
  0x23   :  { %245 = vmatpush.msrb.mxu1 %v134_v57  ;;  %219 = vmatpush.msra.mxu3 %v88_v3  ;;  %v119_v38 = vld [vmem:[%s953_s1 + $0x280] sm:$0xff]  ;;  %v37_v40 = vld [vmem:[%s955_s0 + $0x28] sm:$0xff]  ;;  %v293_v41 = vld [vmem:[%s957_s3 + $0x38] sm:$0xff] }
  0x24   :  { %226 = vmatpush.msrb.mxu0 %v117_v60  ;;  %200 = vmatpush.msra.mxu2 %v71_v6  ;;  %v36_v39 = vld [vmem:[%s955_s0 + $0x20] sm:$0xff]  ;;  %v292_v42 = vld [vmem:[%s957_s3 + $0x30] sm:$0xff]  ;;  %v291_v43 = vld [vmem:[%s957_s3 + $0x28] sm:$0xff] }
  0x25   :  { %246 = vmatpush.msrb.mxu1 %v133_v61  ;;  %220 = vmatpush.msra.mxu3 %v87_v7  ;;  %v290_v44 = vld [vmem:[%s957_s3 + $0x20] sm:$0xff]  ;;  %v289_v45 = vld [vmem:[%s957_s3 + $0x18] sm:$0xff]  ;;  %v288_v46 = vld [vmem:[%s957_s3 + $0x10] sm:$0xff] }
  0x26   :  { %227 = vmatpush.msrb.mxu0 %v116_v0  ;;  %201 = vmatmul.f32.vlgmr.msra.gmra.mxu2 %v34_v10  ;;  %v287_v47 = vld [vmem:[%s957_s3 + $0x8] sm:$0xff]  ;;  %v286_v48 = vld [vmem:[%s957_s3] sm:$0xff]  ;;  %v330_v51 = vld [vmem:[%s958_s5 + $0x38] sm:$0xff] }
  0x27   :  { %247 = vmatpush.msrb.mxu1 %v132_v1  ;;  %161 = vmatmul.f32.vlgmr.msra.gmra.mxu0 %v32_v11  ;;  %v332_v49 = vld [vmem:[%s958_s5 + $0x48] sm:$0xff]  ;;  %v331_v50 = vld [vmem:[%s958_s5 + $0x40] sm:$0xff]  ;;  %v329_v52 = vld [vmem:[%s958_s5 + $0x30] sm:$0xff] }
  0x28   :  { %228 = vmatpush.msrb.mxu0 %v115_v4  ;;  %221 = vmatmul.f32.vlgmr.msra.gmra.mxu3 %v35_v14  ;;  %v463_v53 = vld [vmem:[%s954_s2] ss:$0 sm:$0xff]  ;;  %v328_v54 = vld [vmem:[%s958_s5 + $0x28] sm:$0xff]  ;;  %v326_v58 = vld [vmem:[%s958_s5 + $0x18] sm:$0xff] }
  0x29   :  { %248 = vmatpush.msrb.mxu1 %v131_v5  ;;  %279 = vmatpush.msrb.mxu3 %v136_v18  ;;  %v327_v56 = vld [vmem:[%s958_s5 + $0x20] sm:$0xff]  ;;  %v376_v11 = vld [vmem:[%s960_s7 + $0x70] sm:$0xff]  ;;  %v373_v14 = vld [vmem:[%s960_s7 + $0x58] sm:$0xff] }
  0x2a   :  { %229 = vmatpush.msrb.mxu0 %v114_v8  ;;  %181 = vmatmul.f32.vlgmr.msra.gmra.mxu1 %v33_v15  ;;  %v325_v8 = vld [vmem:[%s958_s5 + $0x10] sm:$0xff]  ;;  %v323_v10 = vld [vmem:[%s958_s5] sm:$0xff]  ;;  %v369_v18 = vld [vmem:[%s960_s7 + $0x38] sm:$0xff] }
  0x2b   :  { %249 = vmatpush.msrb.mxu1 %v130_v9  ;;  %280 = vmatpush.msrb.mxu3 %v135_v21  ;;  %v324_v9 = vld [vmem:[%s958_s5 + $0x8] sm:$0xff]  ;;  %v372_v15 = vld [vmem:[%s960_s7 + $0x50] sm:$0xff]  ;;  %v366_v21 = vld [vmem:[%s960_s7 + $0x20] sm:$0xff] }
  0x2c   :  { %230 = vmatpush.msrb.mxu0 %v113_v12  ;;  %310 = vmatpush.msrb.mxu2 %v293_v41  ;;  %v375_v12 = vld [vmem:[%s960_s7 + $0x68] sm:$0xff] }
  0x2d   :  { %250 = vmatpush.msrb.mxu1 %v129_v13  ;;  %386 = vmatpush.msra.mxu3 %v376_v11  ;;  %v374_v13 = vld [vmem:[%s960_s7 + $0x60] sm:$0xff] }
  0x2e   :  { %231 = vmatpush.msrb.mxu0 %v112_v16  ;;  %311 = vmatpush.msrb.mxu2 %v292_v42  ;;  %v371_v16 = vld [vmem:[%s960_s7 + $0x48] sm:$0xff] }
  0x2f   :  { %251 = vmatpush.msrb.mxu1 %v128_v17  ;;  %387 = vmatpush.msra.mxu3 %v375_v12  ;;  %v370_v17 = vld [vmem:[%s960_s7 + $0x40] sm:$0xff] }
  0x30   :  { %232 = vmatpush.msrb.mxu0 %v111_v19  ;;  %458 = vmatmul.msk.f32.vlgmr.msrb.gmra.mxu3 %vm141_vm0, %v38_v26  ;;  %v368_v19 = vld [vmem:[%s960_s7 + $0x30] sm:$0xff] }
  0x31   :  { %252 = vmatpush.msrb.mxu1 %v127_v20  ;;  %312 = vmatpush.msrb.mxu2 %v291_v43  ;;  %v367_v20 = vld [vmem:[%s960_s7 + $0x28] sm:$0xff] }
  0x32   :  { %233 = vmatpush.msrb.mxu0 %v110_v22  ;;  %388 = vmatpush.msra.mxu3 %v374_v13  ;;  %v365_v22 = vld [vmem:[%s960_s7 + $0x18] sm:$0xff] }
  0x33   :  { %253 = vmatpush.msrb.mxu1 %v126_v23  ;;  %313 = vmatpush.msrb.mxu2 %v290_v44  ;;  %v464_v23 = vld [vmem:[%s956_s4] ss:$0 sm:$0xff] }
  0x34   :  { %234 = vmatpush.msrb.mxu0 %v109_v24  ;;  %389 = vmatpush.msra.mxu3 %v373_v14 }
  0x35   :  { %254 = vmatpush.msrb.mxu1 %v125_v25  ;;  %314 = vmatpush.msrb.mxu2 %v289_v45 }
  0x36   :  { %235 = vmatpush.msrb.mxu0 %v108_v27  ;;  %390 = vmatpush.msra.mxu3 %v372_v15  ;;  %v364_v27 = vld [vmem:[%s960_s7 + $0x10] sm:$0xff] }
  0x37   :  { %255 = vmatpush.msrb.mxu1 %v124_v28  ;;  %315 = vmatpush.msrb.mxu2 %v288_v46  ;;  %v363_v28 = vld [vmem:[%s960_s7 + $0x8] sm:$0xff] }
  0x38   :  { %236 = vmatpush.msrb.mxu0 %v107_v29  ;;  %391 = vmatpush.msra.mxu3 %v371_v16  ;;  %v362_v29 = vld [vmem:[%s960_s7] sm:$0xff] }
  0x39   :  { %256 = vmatpush.msrb.mxu1 %v123_v30  ;;  %316 = vmatpush.msrb.mxu2 %v287_v47  ;;  %v465_v30 = vld [vmem:[%s959_s6] ss:$0 sm:$0xff] }
  0x3a   :  { %237 = vmatpush.msrb.mxu0 %v106_v31  ;;  %392 = vmatpush.msra.mxu3 %v370_v17 }
  0x3b   :  { %257 = vmatpush.msrb.mxu1 %v122_v32  ;;  %317 = vmatpush.msrb.mxu2 %v286_v48 }
  0x3c   :  { %238 = vmatpush.msrb.mxu0 %v105_v33  ;;  %393 = vmatpush.msra.mxu3 %v369_v18 }
  0x3d   :  { %258 = vmatpush.msrb.mxu1 %v121_v34  ;;  %347 = vmatpush.msra.mxu2 %v332_v49  ;;  %v466_v34 = vld [vmem:[%s961_s8] ss:$0 sm:$0xff] }
  0x3e   :  { %239 = vmatpush.msrb.mxu0 %v104_v35  ;;  %394 = vmatpush.msra.mxu3 %v368_v19 }
  0x3f   :  { %259 = vmatpush.msrb.mxu1 %v120_v36  ;;  %348 = vmatpush.msra.mxu2 %v331_v50 }
  0x40   :  { %240 = vmatpush.msrb.mxu0 %v103_v37  ;;  %395 = vmatpush.msra.mxu3 %v367_v20 }
  0x41   :  { %260 = vmatpush.msrb.mxu1 %v119_v38  ;;  %241 = vmatmul.f32.vlgmr.msrb.gmra.mxu0 %v36_v39 }
  0x42   :  { %261 = vmatmul.f32.vlgmr.msrb.gmra.mxu1 %v37_v40  ;;  %349 = vmatpush.msra.mxu2 %v330_v51 }
  0x43   :  { %396 = vmatpush.msra.mxu3 %v366_v21 }
  0x44   :  { %350 = vmatpush.msra.mxu2 %v329_v52 }
  0x45   :  { %397 = vmatpush.msra.mxu3 %v365_v22 }
  0x46   :  { %351 = vmatpush.msra.mxu2 %v328_v54 }
  0x47   :  { %398 = vmatpush.msra.mxu3 %v364_v27 }
  0x48   :  { %352 = vmatpush.msra.mxu2 %v327_v56 }
  0x49   :  { %399 = vmatpush.msra.mxu3 %v363_v28 }
  0x4a   :  { %353 = vmatpush.msra.mxu2 %v326_v58 }
  0x4b   :  { %400 = vmatpush.msra.mxu3 %v362_v29 }
  0x4c   :  { %354 = vmatpush.msra.mxu2 %v325_v8 }
  0x4e   :  { %355 = vmatpush.msra.mxu2 %v324_v9 }
  0x50   :  { %356 = vmatpush.msra.mxu2 %v323_v10 }
  0xa4   :  { %v162_v55 = vpop.f32.mrf.mxu0 }
  0xa5   :  { %v163_v57 = vadd.f32 %v463_v53, %v162_v55 }
  0xa7   :  { %v182_v59 = vpop.f32.mrf.mxu1 }
  0xa8   :  { %v183_v60 = vadd.f32 %v182_v59, %v163_v57 }
  0xa9   :  { %v202_v61 = vpop.f32.mrf.mxu2 }
  0xaa   :  { %v203_v63 = vadd.f32 %v202_v61, %v183_v60 }
  0xab   :  { %v222_v62 = vpop.f32.mrf.mxu3 }
  0xac   :  { %v223_v0 = vadd.f32 %v222_v62, %v203_v63 }
  0xb3   :  { %v282_v4 = vpop.f32.mrf.mxu3 }
  0xbe   :  { %v242_v1 = vpop.f32.mrf.mxu0 }
  0xbf   :  { %v262_v2 = vpop.f32.mrf.mxu1  ;;  %v243_v3 = vadd.f32 %v242_v1, %v223_v0 }
  0xc1   :  { %v263_v5 = vadd.f32 %v262_v2, %v243_v3 }
  0xc3   :  { %v283_v6 = vadd.f32 %v282_v4, %v263_v5 }
  0xc5   :  { %v285_v7 = vmax.f32 %v283_v6, 0.0 }
  0xc7   :  { %459 = vmatmul.msk.f32.vlgmr.msrb.gmra.mxu2 %vm298_vm1, %v285_v7 }
 0x14a   :  { %v319_v24 = vpop.f32.mrf.mxu2 }
 0x14b   :  { %v320_v25 = vadd.f32 %v464_v23, %v319_v24 }
 0x14d   :  { %v322_v26 = vmax.f32 %v320_v25, 0.0 }
 0x14f   :  { %460 = vmatmul.msk.f32.vlgmr.msra.gmra.mxu2 %vm337_vm2, %v322_v26 }
 0x1d2   :  { %v358_v31 = vpop.f32.mrf.mxu2 }
 0x1d3   :  { %v359_v32 = vadd.f32 %v465_v30, %v358_v31 }
 0x1d5   :  { %v361_v33 = vmax.f32 %v359_v32, 0.0 }
 0x1d7   :  { %461 = vmatmul.msk.f32.vlgmr.msra.gmra.mxu3 %vm381_vm3, %v361_v33 }
 0x25a   :  { %v402_v35 = vpop.f32.mrf.mxu3 }
 0x25b   :  { %v403_v36 = vadd.f32 %v466_v34, %v402_v35 }
 0x25d   :  { %v406_v37 = vsel %vm405_vm4, %v403_v36, -inf }
 0x25e   :  { %407 = vmax.xlane.f32.xlu0 %v406_v37 }
 0x2d1   :  { %v408_v38 = vpop.xlane.xlu0 %407 }
 0x2d2   :  { %v409_v39 = vsub.f32 %v403_v36, %v408_v38 }
 0x2d4   :  { %v410_v40 = vmul.f32 1.442695, %v409_v39 }
 0x2d6   :  { %467 = vpow2.f32 %v410_v40 }
 0x2dc   :  { %v468_v41 = vpop.eup %467 }
 0x2dd   :  { %v412_v42 = vsel %vm405_vm4, %v468_v41, 0.0 }
 0x2de   :  { %413 = vadd.xlane.f32.xlu0 %v412_v42 }
 0x351   :  { %v414_v43 = vpop.xlane.xlu0 %413 }
 0x352   :  { %469 = vlog2.f32 %v414_v43 }
 0x358   :  { %v470_v44 = vpop.eup %469 }
 0x359   :  { %v416_v45 = vmul.f32 0.6931472, %v470_v44 }
 0x35b   :  { %v417_v46 = vsub.f32 %v409_v39, %v416_v45 }
 0x35d   :  { %418 = vxpose.xlu1.b32.start.end [1/1] (short) (narrow) %v417_v46, 16 }
 0x401   :  { %v434_v47 = vpop.trf.xlu1 }
 0x402   :  { %451 = vst.msk [vmem:[%s962_s9] sm:$0xff] %vm450_vm5, %v434_v47 }
 0x409   :  { %v435_v48 = vpop.trf.xlu1 }
 0x40a   :  { %453 = vst.msk [vmem:[%s962_s9 + $0x8] sm:$0x3] %vm452_vm6, %v435_v48 }

</bundles_post_ra>
